<compile_context>
chip_gen: v7x
topology: tpu7x:2x2x1
jax: 0.10.0
libtpu: 0.0.40
codegen_flags: <defaults>
</compile_context>

<pallas_src>
import functools

import numpy as np
import jax
import jax.numpy as jnp
from jax.experimental import pallas as pl
from jax.experimental.pallas import tpu as pltpu


def _round_up(x, m):
    return (x + m - 1) // m * m


def _reservoir_seq_kernel(x_ref, wcat_ref, init_ref,
                          spikes_ref, final_state_ref,
                          xs_cat_ref, *, i_pad):
    """One grid step == one reservoir time step.

    x_ref:           (1, Bp, Ip)     current input slice (zero padded)
    wcat_ref:        (Ip+Op, Op)     fused [W_in.T ; W_res] (VMEM resident)
    init_ref:        (Bp, Op)        initial reservoir state (VMEM resident)
    spikes_ref:      (1, Bp, Op)     spike output for this step
    final_state_ref: (Bp, Op)        reservoir state after the last step
    xs_cat_ref:      (Bp, Ip+Op)     scratch holding the fused operand
                                     [x_t | state_t]; the state tail is
                                     carried across grid steps.
    """
    t = pl.program_id(0)

    # Seed the carried state once.
    @pl.when(t == 0)
    def _():
        xs_cat_ref[:, i_pad:] = init_ref[...].astype(xs_cat_ref.dtype)

    # Fresh input slice for this step (padding columns already zero).
    xs_cat_ref[:, :i_pad] = x_ref[0]

    # Single fused MXU matmul with f32 accumulation:
    #   pre = [x | state] @ [[W_in.T], [W_res]]
    pre = jnp.dot(xs_cat_ref[...], wcat_ref[...],
                  preferred_element_type=jnp.float32)

    # Spike straight from the pre-activation (heaviside(tanh(v), 0) ==
    # heaviside-like on v since tanh is monotone with tanh(0)=0).
    spikes_ref[0] = jnp.where(pre > 0.0, 1.0, 0.0).astype(spikes_ref.dtype)

    # New state, carried in the fused operand for the next step.
    new_state = jnp.tanh(pre).astype(xs_cat_ref.dtype)
    xs_cat_ref[:, i_pad:] = new_state

    @pl.when(t == pl.num_programs(0) - 1)
    def _():
        final_state_ref[...] = new_state.astype(final_state_ref.dtype)


def reservoir_run(xs, input_weights, reservoir_weights, initial_state=None,
                  *, compute_dtype=jnp.float32):
    """Run T reservoir steps in a single Pallas kernel.

    Args:
      xs: (T, B, I) inputs, one per time step.
      input_weights: (O, I)   (PyTorch layout; transposed once here).
      reservoir_weights: (O, O).
      initial_state: optional (B, O); zeros if None (module's reset_state).
      compute_dtype: MXU operand dtype (f32 or bf16); accumulation is f32.

    Returns:
      spikes:      (T, B, O) float32 — the module's forward output per step.
      final_state: (B, O)    float32 — the module's reservoir_state after T steps.
    """
    T, B, I = xs.shape
    O = input_weights.shape[0]
    assert input_weights.shape == (O, I)
    assert reservoir_weights.shape == (O, O)

    Bp = _round_up(max(B, 8), 8)
    Ip = _round_up(max(I, 128), 128)
    Op = _round_up(max(O, 128), 128)

    if initial_state is None:
        initial_state = jnp.zeros((B, O), dtype=jnp.float32)
    assert initial_state.shape == (B, O)

    itemsize = np.dtype(compute_dtype).itemsize

    # Zero-pad to lane-dense shapes (padding is inert for the recurrence).
    xs_p = jnp.zeros((T, Bp, Ip), compute_dtype).at[:, :B, :I].set(
        xs.astype(compute_dtype))
    init_p = jnp.zeros((Bp, Op), compute_dtype).at[:B, :O].set(
        initial_state.astype(compute_dtype))

    # Fused weight matrix, built once:  rows [0, Ip)     -> W_in.T (padded)
    #                                   rows [Ip, Ip+Op) -> W_res  (padded)
    w_in_t = jnp.zeros((Ip, Op), compute_dtype).at[:I, :O].set(
        input_weights.T.astype(compute_dtype))
    w_res_p = jnp.zeros((Op, Op), compute_dtype).at[:O, :O].set(
        reservoir_weights.astype(compute_dtype))
    w_cat = jnp.concatenate([w_in_t, w_res_p], axis=0)      # (Ip+Op, Op)

    kernel = functools.partial(_reservoir_seq_kernel, i_pad=Ip)

    cost = pl.CostEstimate(
        flops=2 * T * Bp * (Ip + Op) * Op,
        transcendentals=T * Bp * Op,
        bytes_accessed=(xs_p.size + w_cat.size + init_p.size) * itemsize
                       + (T * Bp * Op + Bp * Op) * 4,
    )

    # VMEM budget: resident weights + double-buffered per-step slices + scratch.
    vmem_needed = (
        w_cat.size * itemsize          # resident fused weights
        + init_p.size * itemsize       # resident initial state
        + 2 * Bp * Ip * itemsize       # double-buffered x slice
        + 2 * Bp * Op * 4              # double-buffered spike slice
        + Bp * Op * 4                  # final-state output block
        + Bp * (Ip + Op) * itemsize    # fused-operand scratch
    )
    # Cap below v7x's 64 MiB physical VMEM; very large O needs tiling instead.
    # TODO(synk): tile the (O, O) contraction over an (N, K) grid for O >~ 2048.
    vmem_limit = int(min(64 * 2**20, max(2 * vmem_needed, 16 * 2**20)))

    spikes_p, final_p = pl.pallas_call(
        kernel,
        out_shape=(
            jax.ShapeDtypeStruct((T, Bp, Op), jnp.float32),   # spikes
            jax.ShapeDtypeStruct((Bp, Op), jnp.float32),      # final state
        ),
        grid_spec=pltpu.PrefetchScalarGridSpec(
            num_scalar_prefetch=0,
            grid=(T,),
            in_specs=[
                pl.BlockSpec((1, Bp, Ip), lambda t: (t, 0, 0)),   # xs (per step)
                pl.BlockSpec((Ip + Op, Op), lambda t: (0, 0)),    # W_cat (resident)
                pl.BlockSpec((Bp, Op), lambda t: (0, 0)),         # init  (resident)
            ],
            out_specs=(
                pl.BlockSpec((1, Bp, Op), lambda t: (t, 0, 0)),   # spikes
                pl.BlockSpec((Bp, Op), lambda t: (0, 0)),         # final state
            ),
            scratch_shapes=[pltpu.VMEM((Bp, Ip + Op), compute_dtype)],
        ),
        compiler_params=pltpu.CompilerParams(
            dimension_semantics=("arbitrary",),
            vmem_limit_bytes=vmem_limit,
        ),
        cost_estimate=cost,
    )(xs_p, w_cat, init_p)

    return spikes_p[:, :B, :O], final_p[:B, :O]


if __name__ == "__main__":
    batch = 2
    input_size = 16
    output_size = 32
    seq_len = 8
    distance_decay = 0.5

    key = jax.random.PRNGKey(0)
    k_win, k_mask, k_x = jax.random.split(key, 3)

    # Parameter init mirroring the module's __init__.
    input_weights = jax.random.uniform(k_win, (output_size, input_size),
                                       dtype=jnp.float32)
    idx = jnp.arange(output_size)
    distances = jnp.abs(idx[:, None] - idx[None, :]).astype(jnp.float32)
    mask = (jax.random.uniform(k_mask, (output_size, output_size)) < 0.5)
    reservoir_weights = jnp.exp(-distance_decay * distances) * mask.astype(
        jnp.float32)

    # Inputs in [-1, 1) so the heaviside output is non-trivial.
    xs = jax.random.uniform(k_x, (seq_len, batch, input_size),
                            dtype=jnp.float32, minval=-1.0, maxval=1.0)

    # Full sequence in one fused kernel call.
    spikes, final_state = reservoir_run(xs, input_weights, reservoir_weights)

    # Stateful step-by-step style usage: two calls, carrying the state.
    spikes_a, state_a = reservoir_run(xs[:5], input_weights, reservoir_weights)
    spikes_b, state_b = reservoir_run(xs[5:], input_weights, reservoir_weights,
                                      initial_state=state_a)
    jax.block_until_ready((spikes, final_state, spikes_a, spikes_b, state_b))

    # Pure-JAX reference (f32, highest-precision matmuls).
    def ref_run(xs_seq, st):
        sp, pr = [], []
        for t in range(xs_seq.shape[0]):
            pre = (jnp.dot(xs_seq[t], input_weights.T,
                           precision=jax.lax.Precision.HIGHEST)
                   + jnp.dot(st, reservoir_weights,
                             precision=jax.lax.Precision.HIGHEST))
            st = jnp.tanh(pre)
            sp.append(jnp.where(st > 0.0, 1.0, 0.0))
            pr.append(pre)
        return jnp.stack(sp), st, jnp.stack(pr)

    ref_spikes, ref_state, ref_pre = ref_run(
        xs, jnp.zeros((batch, output_size), jnp.float32))

    # Spikes must match wherever the pre-activation is decisively non-zero.
    decisive = jnp.abs(ref_pre) > 1e-4
    assert bool(jnp.all((spikes == ref_spikes) | ~decisive)), "spike mismatch"
    assert jnp.allclose(final_state, ref_state, atol=1e-5), "state mismatch"
    assert jnp.allclose(state_b, ref_state, atol=1e-5), "chained state mismatch"
    chained = jnp.concatenate([spikes_a, spikes_b], axis=0)
    assert bool(jnp.all((chained == ref_spikes) | ~decisive)), \
        "chained spike mismatch"

    print("KERNEL_OK")
</pallas_src>

<mosaic_0001>
module attributes {stable_mosaic.version = 11 : i64} {
  func.func @_reservoir_seq_kernel(%arg0: i32, %arg1: memref<1x8x128xf32, #tpu.memory_space<vmem>>, %arg2: memref<256x128xf32, #tpu.memory_space<vmem>>, %arg3: memref<8x128xf32, #tpu.memory_space<vmem>>, %arg4: memref<1x8x128xf32, #tpu.memory_space<vmem>>, %arg5: memref<8x128xf32, #tpu.memory_space<vmem>>, %arg6: memref<8x256xf32, #tpu.memory_space<vmem>>) attributes {dimension_semantics = [#tpu.dimension_semantics<arbitrary>], iteration_bounds = array<i64: 8>, scalar_prefetch = 0 : i64, scratch_operands = 1 : i64, tpu.core_type = #tpu.core_type<tc>, window_params = [{transform_indices = @transform_0, window_bounds = array<i64: 1, 8, 128>}, {pipeline_mode = #tpu.pipeline_mode<synchronous>, transform_indices = @transform_1, window_bounds = array<i64: 256, 128>}, {pipeline_mode = #tpu.pipeline_mode<synchronous>, transform_indices = @transform_2, window_bounds = array<i64: 8, 128>}, {transform_indices = @transform_3, window_bounds = array<i64: 1, 8, 128>}, {pipeline_mode = #tpu.pipeline_mode<synchronous>, transform_indices = @transform_4, window_bounds = array<i64: 8, 128>}]} {
    %c0_i32 = arith.constant 0 : i32
    %0 = arith.cmpi eq, %arg0, %c0_i32 : i32
    %1 = arith.extui %0 : i1 to i32
    %c0_i32_0 = arith.constant 0 : i32
    %2 = arith.cmpi ne, %1, %c0_i32_0 : i32
    scf.if %2 {
      %c0_17 = arith.constant 0 : index
      %c0_18 = arith.constant 0 : index
      %22 = vector.load %arg3[%c0_17, %c0_18] : memref<8x128xf32, #tpu.memory_space<vmem>>, vector<8x128xf32>
      %c0_19 = arith.constant 0 : index
      %c128_20 = arith.constant 128 : index
      %23 = vector.load %arg6[%c0_19, %c128_20] : memref<8x256xf32, #tpu.memory_space<vmem>>, vector<8x128xf32>
      tpu.vector_store %arg6[%c0_19, %c128_20], %22 {strides = array<i32>} : memref<8x256xf32, #tpu.memory_space<vmem>>, vector<8x128xf32>,
    } else {
    }
    %c0 = arith.constant 0 : index
    %c0_1 = arith.constant 0 : index
    %c0_2 = arith.constant 0 : index
    %3 = vector.load %arg1[%c0, %c0_1, %c0_2] : memref<1x8x128xf32, #tpu.memory_space<vmem>>, vector<1x8x128xf32>
    %4 = vector.shape_cast %3 : vector<1x8x128xf32> to vector<8x128xf32>
    %c0_3 = arith.constant 0 : index
    %c0_4 = arith.constant 0 : index
    %5 = vector.load %arg6[%c0_3, %c0_4] : memref<8x256xf32, #tpu.memory_space<vmem>>, vector<8x128xf32>
    tpu.vector_store %arg6[%c0_3, %c0_4], %4 {strides = array<i32>} : memref<8x256xf32, #tpu.memory_space<vmem>>, vector<8x128xf32>,
    %c0_5 = arith.constant 0 : index
    %c0_6 = arith.constant 0 : index
    %6 = vector.load %arg6[%c0_5, %c0_6] : memref<8x256xf32, #tpu.memory_space<vmem>>, vector<8x256xf32>
    %c0_7 = arith.constant 0 : index
    %c0_8 = arith.constant 0 : index
    %7 = vector.load %arg2[%c0_7, %c0_8] : memref<256x128xf32, #tpu.memory_space<vmem>>, vector<256x128xf32>
    %cst = arith.constant dense<0.000000e+00> : vector<8x128xf32>
    %8 = tpu.matmul %6, %7, %cst {dimension_numbers = #tpu.dot_dimension_numbers<[1], [0], [0], [1], [0, 0, 1, 1], [], []>} : vector<8x256xf32>, vector<256x128xf32>, vector<8x128xf32> -> vector<8x128xf32>
    %cst_9 = arith.constant 0.000000e+00 : f32
    %9 = vector.broadcast %cst_9 : f32 to vector<8x128xf32>
    %10 = arith.cmpf ogt, %8, %9 : vector<8x128xf32>
    %cst_10 = arith.constant 1.000000e+00 : f32
    %cst_11 = arith.constant 0.000000e+00 : f32
    %11 = vector.broadcast %cst_10 : f32 to vector<8x128xf32>
    %12 = vector.broadcast %cst_11 : f32 to vector<8x128xf32>
    %13 = arith.select %10, %11, %12 : vector<8x128xi1>, vector<8x128xf32>
    %c0_12 = arith.constant 0 : index
    %c0_13 = arith.constant 0 : index
    %c0_14 = arith.constant 0 : index
    %14 = vector.load %arg4[%c0_12, %c0_13, %c0_14] : memref<1x8x128xf32, #tpu.memory_space<vmem>>, vector<1x8x128xf32>
    %15 = vector.shape_cast %14 : vector<1x8x128xf32> to vector<8x128xf32>
    %16 = vector.shape_cast %13 : vector<8x128xf32> to vector<1x8x128xf32>
    tpu.vector_store %arg4[%c0_12, %c0_13, %c0_14], %16 {strides = array<i32>} : memref<1x8x128xf32, #tpu.memory_space<vmem>>, vector<1x8x128xf32>,
    %17 = math.tanh %8 : vector<8x128xf32>
    %c0_15 = arith.constant 0 : index
    %c128 = arith.constant 128 : index
    %18 = vector.load %arg6[%c0_15, %c128] : memref<8x256xf32, #tpu.memory_space<vmem>>, vector<8x128xf32>
    tpu.vector_store %arg6[%c0_15, %c128], %17 {strides = array<i32>} : memref<8x256xf32, #tpu.memory_space<vmem>>, vector<8x128xf32>,
    %c7_i32 = arith.constant 7 : i32
    %19 = arith.cmpi eq, %arg0, %c7_i32 : i32
    %20 = arith.extui %19 : i1 to i32
    %c0_i32_16 = arith.constant 0 : i32
    %21 = arith.cmpi ne, %20, %c0_i32_16 : i32
    scf.if %21 {
      %c0_17 = arith.constant 0 : index
      %c0_18 = arith.constant 0 : index
      %22 = vector.load %arg5[%c0_17, %c0_18] : memref<8x128xf32, #tpu.memory_space<vmem>>, vector<8x128xf32>
      tpu.vector_store %arg5[%c0_17, %c0_18], %17 {strides = array<i32>} : memref<8x128xf32, #tpu.memory_space<vmem>>, vector<8x128xf32>,
    } else {
    }
    return
  }
  func.func @transform_0(%arg0: i32) -> (i32, i32, i32) {
    %c0_i32 = arith.constant 0 : i32
    %c0_i32_0 = arith.constant 0 : i32
    %c0_i32_1 = arith.constant 0 : i32
    return %arg0, %c0_i32, %c0_i32_0 : i32, i32, i32
  }
  func.func @transform_1(%arg0: i32) -> (i32, i32) {
    %c0_i32 = arith.constant 0 : i32
    %c0_i32_0 = arith.constant 0 : i32
    %c0_i32_1 = arith.constant 0 : i32
    return %c0_i32, %c0_i32_0 : i32, i32
  }
  func.func @transform_2(%arg0: i32) -> (i32, i32) {
    %c0_i32 = arith.constant 0 : i32
    %c0_i32_0 = arith.constant 0 : i32
    %c0_i32_1 = arith.constant 0 : i32
    return %c0_i32, %c0_i32_0 : i32, i32
  }
  func.func @transform_3(%arg0: i32) -> (i32, i32, i32) {
    %c0_i32 = arith.constant 0 : i32
    %c0_i32_0 = arith.constant 0 : i32
    %c0_i32_1 = arith.constant 0 : i32
    return %arg0, %c0_i32, %c0_i32_0 : i32, i32, i32
  }
  func.func @transform_4(%arg0: i32) -> (i32, i32) {
    %c0_i32 = arith.constant 0 : i32
    %c0_i32_0 = arith.constant 0 : i32
    %c0_i32_1 = arith.constant 0 : i32
    return %c0_i32, %c0_i32_0 : i32, i32
  }
}

</mosaic_0001>

<bundles_post_ra>
// kernel: tpu_custom_call.1
= control target key start
LH: loop header
LB: loop body
LE: loop exit
PB: predicated region body
PF: predicated region fallthrough
CT: control target
= control target key end

     0   :  { %10 = vsyncpa [#allocation4], 0  ;;  %s1120_s0 = inlined_call_operand.hbm [shape: f32[8,8,128], index: 0, kind: input, shape index: {}]   ;;  %s1121_s1 = inlined_call_operand.hbm [shape: f32[256,128], index: 1, kind: input, shape index: {}]   ;;  %s1122_s2 = inlined_call_operand.hbm [shape: f32[8,128], index: 2, kind: input, shape index: {}]   ;;  %s1123_s3 = inlined_call_operand.hbm [shape: f32[8,8,128], index: 3, kind: output, shape index: {0}]   ;;  %s1124_s4 = inlined_call_operand.hbm [shape: f32[8,128], index: 4, kind: output, shape index: {1}]  }
   0x1   :  { %12 = vsyncpa [#allocation4 + $0x1], 0 }
   0x2   :  { %13 = vsyncpa [#allocation7], 0 }
   0x3   :  { %14 = vsyncpa [#allocation5], 0 }
   0x4   :  { %16 = vsyncpa [#allocation5 + $0x1], 0 }
   0x5   :  { %17 = vsyncpa [#allocation11], 0  ;;  %s873_s15 = smov 0   ;;  %s875_s16 = smov 0  }
   0x6   :  { %s877_s17 = smov 0   ;;  %s879_s18 = smov 0  }
   0x7 LB: > { %s894_s19 = sadd.s32 4294967295, %s838_s18   ;;  %s486_s20 = sadd.s32 4294967294, %s838_s18   ;;  %s838_s18 = sphi %s879_s18, %s1149_s18   ;;  %s834_s17 = sphi %s877_s17, %s1148_s17   ;;  %s830_s16 = sphi %s875_s16, %s1147_s16   ;;  %s826_s15 = sphi %s873_s15, %s1146_s15  }
   0x8   : > { %p43_p0 = scmp.ne.s32.totalorder %s830_s16, %s826_s15  ;;  %p1125_p1 = scmp.eq.s32.totalorder %s894_s19, 0 }
   0x9   : > { %p115_p3 = scmp.eq.s32.totalorder %s486_s20, 7  ;;  %p487_p5 = scmp.ge.s32.totalorder %s838_s18, 1 }
   0xa   : > { %p903_p4 = por %p1125_p1, %p43_p0  ;;  %p143_p7 = scmp.lt.s32.totalorder %s838_s18, 9 }
   0xb   : > { %p908_p6 = por %p115_p3, %p43_p0  ;;  %s840_s24 = smov [#allocation6]  }
   0xc   : > { %s1128_s21 = scalar_select %p903_p4, 1, 0 }
   0xd   : > { %s1129_s22 = scalar_select %p908_p6, 1, 0 }
   0xe   : > { %p914_p9 = pnand %p487_p5, %p143_p7  ;;  %s155_s25 = sshll.u32 %s840_s24, 4  ;;  %s156_s25 = int_to_ptr.vmem [resolvable:$true] %s155_s25 }
   0xf   : > { %s841_s27 = smov [#allocation8]   ;;  %s652_s5 = scalar_lea.hbm %s1121_s1, 4096 }
  0x10   : > { %s1130_s23 = scalar_select %p914_p9, 1, 0 }
  0x11   : > { %p589_p10 = pneg %p914_p9  ;;  %s169_s28 = sshll.u32 %s841_s27, 4  ;;  %s926_s28 = int_to_ptr.vmem [resolvable:$true] %s169_s28 }
  0x12   : > { %p653_p12 = scmp.ne.s32.totalorder %s1121_s1, %s652_s5  ;;  %p659_p5 = scmp.lt.u32.totalorder %s652_s5, %s1121_s1 }
  0x13   : > { %p922_p11 = pnand %p589_p10, %p1125_p1 }
  0x15   : > { %p654_p13 = pneg %p922_p11 }
  0x17   : > { %p655_p0 = pnand %p654_p13, %p653_p12 }
  0x19   : > { %p656_p3 = pneg %p655_p0 }
  0x1b   : > { %p661_p7 = pnand %p659_p5, %p656_p3 }
  0x1d   : > { %664 = shalt.err (!%p661_p7)
}
  0x1e   : > { %s665_s10 = scalar_lea.vmem %s156_s25, 4096  ;;  %p673_p2 = scmp.lt.s32.totalorder %s156_s25, %s156_s25 }
  0x1f   : > { %p666_p10 = scmp.ne.s32.totalorder %s156_s25, %s665_s10  ;;  %p674_p6 = scmp.lt.s32.totalorder %s665_s10, %s665_s10 }
  0x21   : > { %p668_p8 = pnand %p666_p10, %p654_p13  ;;  %p675_p4 = por %p674_p6, %p673_p2 }
  0x23   : > { %p669_p1 = pneg %p668_p8 }
  0x25   : > { %p676_p9 = pnand %p675_p4, %p669_p1 }
  0x27   : > { %679 = shalt.err (!%p676_p9)
}
  0x28   : > { %s842_s11 = smov 128   ;;  %s843_s12 = smov 8  }
  0x29   : > { %592 = dma.hbm_to_vmem [thread:$0]  (!%p922_p11), %s1121_s1, 4096, %s156_s25, [#allocation7], %s842_s11, %s842_s11, %s843_s12  }
  0x2a   : > { %s680_s27 = scalar_lea.hbm %s1122_s2, 128 }
  0x2b   : > { %p681_p8 = scmp.ne.s32.totalorder %s1122_s2, %s680_s27  ;;  %p687_p4 = scmp.lt.u32.totalorder %s680_s27, %s1122_s2 }
  0x2d   : > { %p683_p1 = pnand %p681_p8, %p654_p13 }
  0x2f   : > { %p684_p2 = pneg %p683_p1 }
  0x31   : > { %p689_p6 = pnand %p687_p4, %p684_p2 }
  0x33   : > { %692 = shalt.err (!%p689_p6)
}
  0x34   : > { %s693_s25 = scalar_lea.vmem %s926_s28, 128  ;;  %p701_p3 = scmp.lt.s32.totalorder %s926_s28, %s926_s28 }
  0x35   : > { %p694_p9 = scmp.ne.s32.totalorder %s926_s28, %s693_s25  ;;  %p702_p5 = scmp.lt.s32.totalorder %s693_s25, %s693_s25 }
  0x37   : > { %p696_p12 = pnand %p694_p9, %p654_p13  ;;  %p703_p7 = por %p702_p5, %p701_p3 }
  0x39   : > { %p697_p0 = pneg %p696_p12 }
  0x3b   : > { %p704_p10 = pnand %p703_p7, %p697_p0 }
  0x3d   : > { %707 = shalt.err (!%p704_p10)
}
  0x3e   : > { %595 = dma.hbm_to_vmem [thread:$0]  (!%p922_p11), %s1122_s2, 128, %s926_s28, [#allocation7]  }
  0x3f   : > { %s976_s9 = sadd.s32 1, %s838_s18   ;;  %s30_s26 = sadd.s32 1, %s834_s17 }
  0x40   : > { %s27_s10 = ssub.s32 %s838_s18, %s976_s9  ;;  %p37_p13 = scmp.ne.s32.totalorder %s834_s17, %s830_s16 }
  0x41   : > { %p28_p8 = scmp.eq.s32.totalorder %s27_s10, 0  ;;  %p38_p1 = scmp.eq.s32.totalorder %s838_s18, 0 }
  0x42   : > { %p1132_p2 = scmp.eq.s32.totalorder %s894_s19, 7  ;;  %p606_p6 = scmp.lt.s32.totalorder %s838_s18, 8 }
  0x43   : > { %s992_s12 = scalar_select %p28_p8, %s834_s17, %s30_s26  }
  0x44   : > { %p986_p4 = por %p1132_p2, %p37_p13  ;;  %p39_p9 = por %p38_p1, %p37_p13 }
  0x45   : > { %s180_s13 = sand.u32 1, %s834_s17   ;;  %s492_s28 = sshll.u32 %s838_s18, 7 }
  0x46   : > { %s491_s14 = sshll.u32 %s180_s13, 3  ;;  %s999_s27 = scalar_lea.hbm %s1120_s0, %s492_s28 }
  0x47   : > { %s184_s29 = scalar_lea.vmem [#allocation3], %s491_s14  ;;  %p1003_p11 = pnand %p606_p6, %p39_p9 }
  0x48   : > { %s191_s30 = sshll.u32 %s184_s29, 4  ;;  %s181_s6 = scalar_lea.sflag [#allocation4], %s180_s13  ;;  %s1001_s30 = int_to_ptr.vmem [resolvable:$true] %s191_s30 }
  0x49   : > { %s708_s25 = scalar_lea.hbm %s999_s27, 128  ;;  %p710_p0 = pneg %p1003_p11 }
  0x4a   : > { %p709_p12 = scmp.ne.s32.totalorder %s999_s27, %s708_s25  ;;  %s713_s26 = scalar_lea.hbm %s1120_s0, 1024 }
  0x4b   : > { %p714_p7 = scmp.lt.u32.totalorder %s999_s27, %s1120_s0  ;;  %p715_p10 = scmp.lt.u32.totalorder %s713_s26, %s708_s25 }
  0x4c   : > { %p711_p3 = pnand %p710_p0, %p709_p12  ;;  %p717_p8 = scmp.lt.u32.totalorder %s708_s25, %s999_s27 }
  0x4d   : > { %p716_p13 = por %p715_p10, %p714_p7 }
  0x4e   : > { %p712_p5 = pneg %p711_p3 }
  0x4f   : > { %p718_p1 = por %p717_p8, %p716_p13 }
  0x51   : > { %p719_p2 = pnand %p718_p1, %p712_p5 }
  0x53   : > { %722 = shalt.err (!%p719_p2)
}
  0x54   : > { %s723_s13 = scalar_lea.vmem %s1001_s30, 128  ;;  %s844_s28 = smov [#allocation3]  }
  0x55   : > { %p724_p6 = scmp.ne.s32.totalorder %s1001_s30, %s723_s13  ;;  %s728_s20 = sshll.u32 %s844_s28, 4  ;;  %s729_s20 = int_to_ptr.vmem [resolvable:$false] %s728_s20 }
  0x56   : > { %s730_s24 = scalar_lea.vmem %s729_s20, 256  ;;  %p731_p3 = scmp.lt.s32.totalorder %s1001_s30, %s729_s20 }
  0x57   : > { %p726_p9 = pnand %p724_p6, %p710_p0  ;;  %p732_p7 = scmp.lt.s32.totalorder %s730_s24, %s723_s13 }
  0x59   : > { %p727_p12 = pneg %p726_p9  ;;  %p733_p10 = por %p732_p7, %p731_p3 }
  0x5b   : > { %p734_p13 = pnand %p733_p10, %p727_p12 }
  0x5d   : > { %737 = shalt.err (!%p734_p13)
}
  0x5e   : > { %599 = dma.hbm_to_vmem [thread:$0]  (!%p1003_p11), %s999_s27, 128, %s1001_s30, %s181_s6  }
  0x5f   : > { %p1135_p5 = scmp.ne.s32.totalorder %s1130_s23, 0 }
  0x60   : > { %s1035_s29 = sand.u32 (!%p1135_p5), 1, %s830_s16   ;;  %p1136_p0 = scmp.ne.s32.totalorder (!%p1135_p5), %s1128_s21, 0 }
  0x61   : > { %200 = sbr.rel (%p1135_p5) target bundleno = 432 (0x1b0), region = 32  ;;  %s494_s25 = sshll.u32 (!%p1135_p5), %s1035_s29, 3 }
  0x62   : > { %s203_s7 = scalar_lea.sflag (!%p1135_p5), [#allocation4], %s1035_s29  ;;  %s1039_s8 = scalar_lea.vmem (!%p1135_p5), [#allocation3], %s494_s25 }
  0x68   : > { %809 = dma.done.wait (%p1136_p0), %s203_s7, 128  }
  0x69   : > { %811 = vsyncadd (%p1136_p0), %s203_s7, 4294967168  ;;  %p1137_p11 = scmp.eq.s32.totalorder %s894_s19, 0 }
  0x6b   : > { %813 = dma.done.wait (%p1137_p11), [#allocation7], 4224   ;;  %p1138_p8 = pmov %p1137_p11 }
  0x6c   : > { %s1049_s23 = scalar_lea.vmem [#allocation9], %s494_s25  ;;  %p1139_p1 = scmp.ne.s32.totalorder %s894_s19, 0 }
  0x6d   : > { %815 = vsyncadd (%p1138_p8), [#allocation7], 4294963072  ;;  %v243_v0 = vld [vmem:[#allocation8] sm:$0xff] (!%p1139_p1) }
  0x6e   : > { %242 = sbr.rel (%p1139_p1) target bundleno = 117 (0x75), region = 48  ;;  %244 = vst [vmem:[#allocation2 + $0x8] sm:$0xff] (!%p1139_p1), %v243_v0 }
  0x75 PF: > { %v265_v1 = vld [vmem:[#allocation6 + $0x80] sm:$0xff]  ;;  %v266_v2 = vld [vmem:[#allocation6 + $0x88] sm:$0xff]  ;;  %v267_v6 = vld [vmem:[#allocation6 + $0x90] sm:$0xff]  ;;  %v845_v54 = vmov 0.0   ;;  %p499_p2 = scmp.ne.s32.totalorder %s894_s19, 7 }
  0x76   : > { %v249_v3 = vld [vmem:[#allocation6] sm:$0xff]  ;;  %v541_v4 = vpack.c.bf16 %v266_v2, %v265_v1  ;;  %v250_v5 = vld [vmem:[#allocation6 + $0x8] sm:$0xff]  ;;  %v268_v7 = vld [vmem:[#allocation6 + $0x98] sm:$0xff] }
  0x77   : > { %v543_v8 = vpack.c.bf16 %v250_v5, %v249_v3  ;;  %v545_v9 = vpack.c.bf16 %v268_v7, %v267_v6  ;;  %v251_v10 = vld [vmem:[#allocation6 + $0x10] sm:$0xff]  ;;  %v252_v11 = vld [vmem:[#allocation6 + $0x18] sm:$0xff]  ;;  %v269_v12 = vld [vmem:[#allocation6 + $0xa0] sm:$0xff] }
  0x78   : > { %542 = vmatprep.subr.bf16.mxu0 %v541_v4  ;;  %v270_v13 = vld [vmem:[#allocation6 + $0xa8] sm:$0xff]  ;;  %v547_v14 = vpack.c.bf16 %v252_v11, %v251_v10  ;;  %v253_v16 = vld [vmem:[#allocation6 + $0x20] sm:$0xff]  ;;  %v271_v18 = vld [vmem:[#allocation6 + $0xb0] sm:$0xff] }
  0x79   : > { %544 = vmatpush3.bf16.msra.mxu0 %v543_v8  ;;  %v549_v15 = vpack.c.bf16 %v270_v13, %v269_v12  ;;  %v254_v17 = vld [vmem:[#allocation6 + $0x28] sm:$0xff]  ;;  %v272_v19 = vld [vmem:[#allocation6 + $0xb8] sm:$0xff]  ;;  %v255_v22 = vld [vmem:[#allocation6 + $0x30] sm:$0xff] }
  0x7a   : > { %546 = vmatprep.subr.bf16.mxu0 %v545_v9  ;;  %v551_v20 = vpack.c.bf16 %v254_v17, %v253_v16  ;;  %v553_v21 = vpack.c.bf16 %v272_v19, %v271_v18  ;;  %v256_v23 = vld [vmem:[#allocation6 + $0x38] sm:$0xff]  ;;  %v273_v24 = vld [vmem:[#allocation6 + $0xc0] sm:$0xff]  ;;  %v274_v25 = vld [vmem:[#allocation6 + $0xc8] sm:$0xff] }
  0x7b   : > { %v248_v26 = vld [vmem:[#allocation2 + $0x8] sm:$0xff]  ;;  %v245_v27 = vld [vmem:[%s1039_s8] sm:$0xff]  ;;  %v555_v28 = vpack.c.bf16 %v256_v23, %v255_v22  ;;  %v557_v29 = vpack.c.bf16 %v274_v25, %v273_v24  ;;  %v257_v30 = vld [vmem:[#allocation6 + $0x40] sm:$0xff] }
  0x7c   : > { %345 = vmatprep.mubr.f32.mxu0 %v248_v26  ;;  %v258_v31 = vld [vmem:[#allocation6 + $0x48] sm:$0xff]  ;;  %v275_v32 = vld [vmem:[#allocation6 + $0xd0] sm:$0xff]  ;;  %v276_v33 = vld [vmem:[#allocation6 + $0xd8] sm:$0xff] }
  0x7d   : > { %548 = vmatpush3.bf16.msra.mxu0 %v547_v14  ;;  %v559_v34 = vpack.c.bf16 %v258_v31, %v257_v30  ;;  %v561_v35 = vpack.c.bf16 %v276_v33, %v275_v32  ;;  %v259_v36 = vld [vmem:[#allocation6 + $0x50] sm:$0xff]  ;;  %v260_v37 = vld [vmem:[#allocation6 + $0x58] sm:$0xff]  ;;  %v277_v38 = vld [vmem:[#allocation6 + $0xe0] sm:$0xff] }
  0x7e   : > { %550 = vmatprep.subr.bf16.mxu0 %v549_v15  ;;  %v278_v39 = vld [vmem:[#allocation6 + $0xe8] sm:$0xff]  ;;  %v563_v40 = vpack.c.bf16 %v260_v37, %v259_v36  ;;  %v261_v42 = vld [vmem:[#allocation6 + $0x60] sm:$0xff]  ;;  %v279_v44 = vld [vmem:[#allocation6 + $0xf0] sm:$0xff] }
  0x7f   : > { %v565_v41 = vpack.c.bf16 %v278_v39, %v277_v38  ;;  %v262_v43 = vld [vmem:[#allocation6 + $0x68] sm:$0xff]  ;;  %v280_v45 = vld [vmem:[#allocation6 + $0xf8] sm:$0xff]  ;;  %v263_v48 = vld [vmem:[#allocation6 + $0x70] sm:$0xff] }
  0x80   : > { %v567_v46 = vpack.c.bf16 %v262_v43, %v261_v42  ;;  %v569_v47 = vpack.c.bf16 %v280_v45, %v279_v44  ;;  %v264_v49 = vld [vmem:[#allocation6 + $0x78] sm:$0xff] }
  0x81   : > { %552 = vmatpush3.bf16.msra.mxu0 %v551_v20  ;;  %v571_v50 = vpack.c.bf16 %v264_v49, %v263_v48 }
  0x82   : > { %554 = vmatprep.subr.bf16.mxu0 %v553_v21 }
  0x85   : > { %556 = vmatpush3.bf16.msra.mxu0 %v555_v28 }
  0x86   : > { %558 = vmatprep.subr.bf16.mxu0 %v557_v29 }
  0x89   : > { %560 = vmatpush3.bf16.msra.mxu0 %v559_v34 }
  0x8a   : > { %562 = vmatprep.subr.bf16.mxu0 %v561_v35 }
  0x8d   : > { %564 = vmatpush3.bf16.msra.mxu0 %v563_v40 }
  0x8e   : > { %566 = vmatprep.subr.bf16.mxu0 %v565_v41 }
  0x91   : > { %568 = vmatpush3.bf16.msra.mxu0 %v567_v46 }
  0x92   : > { %570 = vmatprep.subr.bf16.mxu0 %v569_v47 }
  0x95   : > { %572 = vmatpush3.bf16.msra.mxu0 %v571_v50 }
  0x98   : > { %346 = vmatmul.mubr.f32.vlgmr.msra.gmra.mrb[0].mxu0 %v245_v27 }
 0x16b   : > { %v538_v51 = vpop.f32.mrb[0].mxu0 }
 0x16c   : > { %v539_v52 = vpop.f32.mrb[1].mxu0 }
 0x16d   : > { %v540_v53 = vadd.f32 %v539_v52, %v538_v51 }
 0x16f   : > { %vm351_vm0 = vcmp.gt.f32.partialorder %v540_v53, 0.0  ;;  %650 = vtanh.f32 %v540_v53 }
 0x170   : > { %v352_v55 = vsel %vm351_vm0, 1.0, %v845_v54 }
 0x171   : > { %353 = vst [vmem:[%s1049_s23] sm:$0xff] %v352_v55 }
 0x174   : > { %359 = sbr.rel (%p499_p2) target bundleno = 379 (0x17b), region = 52 }
 0x179   : > { %v651_v56 = vpop.eup %650 }
 0x17a   : > { %355 = vst [vmem:[#allocation2 + $0x8] sm:$0xff] %v651_v56  ;;  %360 = vst [vmem:[#allocation10] sm:$0xff] (!%p499_p2), %v651_v56 }
 0x17b PF: > { %s501_s21 = sshll.u32 %s894_s19, 7  ;;  %s375_s6 = sshll.u32 %s1049_s23, 4  ;;  %s376_s6 = int_to_ptr.vmem [resolvable:$true] %s375_s6 }
 0x17c   : > { %s1060_s5 = scalar_lea.hbm %s1123_s3, %s501_s21  ;;  %s362_s26 = scalar_lea.sflag [#allocation5], %s1035_s29 }
 0x17d   : > { %s738_s10 = scalar_lea.vmem %s376_s6, 128  ;;  %s846_s14 = smov [#allocation9]  }
 0x17e   : > { %p739_p6 = scmp.ne.s32.totalorder %s376_s6, %s738_s10  ;;  %s742_s13 = sshll.u32 %s846_s14, 4  ;;  %s743_s13 = int_to_ptr.vmem [resolvable:$false] %s742_s13 }
 0x17f   : > { %s744_s28 = scalar_lea.vmem %s743_s13, 256  ;;  %p745_p3 = scmp.lt.s32.totalorder %s376_s6, %s743_s13 }
 0x180   : > { %p740_p9 = pnand %p739_p6, %p986_p4  ;;  %p746_p7 = scmp.lt.s32.totalorder %s744_s28, %s738_s10 }
 0x182   : > { %p741_p12 = pneg %p740_p9  ;;  %p747_p10 = por %p746_p7, %p745_p3 }
 0x184   : > { %p748_p13 = pnand %p747_p10, %p741_p12 }
 0x186   : > { %751 = shalt.err (!%p748_p13)
}
 0x187   : > { %s752_s20 = scalar_lea.hbm %s1060_s5, 128  ;;  %s756_s25 = scalar_lea.hbm %s1123_s3, 1024 }
 0x188   : > { %p753_p5 = scmp.ne.s32.totalorder %s1060_s5, %s752_s20  ;;  %p757_p8 = scmp.lt.u32.totalorder %s1060_s5, %s1123_s3 }
 0x189   : > { %p758_p1 = scmp.lt.u32.totalorder %s756_s25, %s752_s20  ;;  %p760_p6 = scmp.lt.u32.totalorder %s752_s20, %s1060_s5 }
 0x18a   : > { %p754_p0 = pnand %p753_p5, %p986_p4 }
 0x18b   : > { %p759_p2 = por %p758_p1, %p757_p8 }
 0x18c   : > { %p755_p11 = pneg %p754_p0 }
 0x18d   : > { %p761_p9 = por %p760_p6, %p759_p2 }
 0x18f   : > { %p762_p12 = pnand %p761_p9, %p755_p11 }
 0x191   : > { %765 = shalt.err (!%p762_p12)
}
 0x192   : > { %583 = dma.vmem_to_hbm [thread:$0]  (%p986_p4), %s376_s6, 128, %s1060_s5, %s362_s26  }
 0x193   : > { %s847_s23 = smov [#allocation10]   ;;  %p1140_p7 = scmp.eq.s32.totalorder %s894_s19, 7 }
 0x194   : > { %s386_s21 = sshll.u32 %s847_s23, 4  ;;  %s387_s21 = int_to_ptr.vmem [resolvable:$true] %s386_s21 }
 0x195   : > { %s766_s27 = scalar_lea.vmem %s387_s21, 128  ;;  %p773_p5 = scmp.lt.s32.totalorder %s387_s21, %s387_s21 }
 0x196   : > { %p767_p3 = scmp.ne.s32.totalorder %s387_s21, %s766_s27  ;;  %p774_p0 = scmp.lt.s32.totalorder %s766_s27, %s766_s27 }
 0x198   : > { %p768_p10 = pnand %p767_p3, %p1140_p7  ;;  %p775_p8 = por %p774_p0, %p773_p5 }
 0x19a   : > { %p769_p13 = pneg %p768_p10 }
 0x19c   : > { %p776_p1 = pnand %p775_p8, %p769_p13 }
 0x19e   : > { %779 = shalt.err (!%p776_p1)
}
 0x19f   : > { %s780_s11 = scalar_lea.hbm %s1124_s4, 128  ;;  %p1141_p11 = pmov %p1140_p7 }
 0x1a0   : > { %p781_p4 = scmp.ne.s32.totalorder %s1124_s4, %s780_s11  ;;  %p786_p9 = scmp.lt.u32.totalorder %s780_s11, %s1124_s4 }
 0x1a2   : > { %p782_p2 = pnand %p781_p4, %p1141_p11 }
 0x1a4   : > { %p783_p6 = pneg %p782_p2 }
 0x1a6   : > { %p788_p12 = pnand %p786_p9, %p783_p6 }
 0x1a8   : > { %791 = shalt.err (!%p788_p12)
}
 0x1a9   : > { %p1142_p3 = pmov %p1140_p7 }
 0x1ab   : > { %585 = dma.vmem_to_hbm [thread:$0]  (%p1142_p3), %s387_s21, 128, %s1124_s4, [#allocation11]  }
 0x1ac   : > { %p1143_p7 = pmov %p1142_p3 }
 0x1ad   : > { %p1144_p10 = pmov %p1142_p3 }
 0x1ae   : > { %817 = dma.done.wait (%p1143_p7), [#allocation11], 128  }
 0x1af   : > { %819 = vsyncadd (%p1144_p10), [#allocation11], 4294967168 }
 0x1b0 PF: > { %p611_p13 = scmp.ge.s32.totalorder %s838_s18, 2  ;;  %s402_s20 = sand.u32 1, %s826_s15  }
 0x1b1   : > { %p1145_p5 = scmp.ne.s32.totalorder %s1129_s22, 0  ;;  %s403_s24 = scalar_lea.sflag [#allocation5], %s402_s20 }
 0x1b3   : > { %p601_p0 = pnand %p611_p13, %p1145_p5 }
 0x1b5   : > { %821 = dma.done.wait (!%p601_p0), %s403_s24, 128  }
 0x1b6   : > { %823 = vsyncadd (!%p601_p0), %s403_s24, 4294967168  ;;  %p20_p8 = scmp.ge.s32.totalorder %s976_s9, 10   ;;  %s1146_s15 = smov %s830_s16 }
 0x1b7   : > { %s1147_s16 = smov %s834_s17  ;;  %s1148_s17 = smov %s992_s12 }
 0x1b8   : > { %s1149_s18 = smov %s976_s9  ;;  %22 = sbr.rel (!%p20_p8) target bundleno = 7 (0x7), region = 101 }
 0x1bf   :  { %408 = vsyncpa [#allocation4], 1 }
 0x1c0   :  { %410 = vsyncpa [#allocation4 + $0x1], 1 }
 0x1c1   :  { %411 = vsyncpa [#allocation7], 1 }
 0x1c2   :  { %412 = vsyncpa [#allocation5], 1 }
 0x1c3   :  { %414 = vsyncpa [#allocation5 + $0x1], 1 }
 0x1c4   :  { %415 = vsyncpa [#allocation11], 1 }

</bundles_post_ra>
